<compile_context>
chip_gen: v7x
topology: tpu7x:2x2x1
jax: 0.10.0
libtpu: 0.0.40
codegen_flags: <defaults>
</compile_context>

<pallas_src>
import functools
import math

import jax
import jax.numpy as jnp
from jax.experimental import pallas as pl
from jax.experimental.pallas import tpu as pltpu

EPS = 1e-6


def pnorm_kernel(x_ref, out_ref, acc_ref, *, p, n_rows, tm):
    j = pl.program_id(0)            # core (parallel) axis
    i = pl.program_id(1)            # row-tile (reduction) axis
    steps = pl.num_programs(1)

    @pl.when(i == 0)
    def _():
        acc_ref[...] = jnp.zeros_like(acc_ref)

    x = x_ref[...].astype(jnp.float32)            # (tm, C)

    # Numerically-stable softmax pieces over the class (lane) axis.
    m = jnp.max(x, axis=-1, keepdims=True)        # (tm, 1)
    e = jnp.exp(x - m)                            # (tm, C)  EUP exp
    s = jnp.sum(e, axis=-1, keepdims=True)        # (tm, 1)

    if p == 0.5:
        # clamp(softmax, eps, 1) ** 0.5 == sqrt(max(softmax, eps)); softmax <= 1
        # so the upper clamp is dead work.  Exact 1/s is only a (tm,1) divide;
        # the full-tile ops are one VPU mul + one EUP sqrt.
        sm = e * (1.0 / s)
        pw = jnp.sqrt(jnp.maximum(sm, EPS))
    else:
        # General p > 0, in the exponent domain:
        #   max(softmax, eps)^p == exp(max(p*(x - m - log s), p*log(eps)))
        # log(s) is on the (tm,1) row-sums only; one full-tile exp.
        t = p * ((x - m) - jnp.log(s))
        pw = jnp.exp(jnp.maximum(t, p * math.log(EPS)))

    # Mask rows beyond the true N (zero-padded rows must not contribute).
    row = (j * steps + i) * tm + jax.lax.broadcasted_iota(jnp.int32, pw.shape, 0)
    pw = jnp.where(row < n_rows, pw, 0.0)

    # Fold (tm, C) -> (8, C) with cheap vreg adds (VPU only); keep the
    # expensive cross-lane reduce for the single finalize step.
    acc_ref[...] += pw.reshape(tm // 8, 8, -1).sum(axis=0)

    @pl.when(i == steps - 1)
    def _():
        total = jnp.sum(acc_ref[...]) * (1.0 / n_rows)
        out_ref[...] = jnp.zeros_like(out_ref) + total


def pnorm(pred, p=0.5, tm=1024, num_cores=2, vmem_budget_bytes=16 * 1024 * 1024):
    """pred: (N, C) logits (f32 or bf16).
    Returns f32 scalar = mean_n sum_c clamp(softmax(pred), eps, 1)^p."""
    assert p > 0, "pNorm exponent must be positive"
    n, c = pred.shape

    # Row tile: multiple of 8, as large as possible while the double-buffered
    # (tm, C) input stays inside the VMEM budget (also fits v7x's 64 MiB VMEM).
    bytes_per_row = 2 * c * pred.dtype.itemsize        # x2: double buffering
    tm_cap = max(8, (vmem_budget_bytes // bytes_per_row) // 8 * 8)
    rows_per_core = -(-n // num_cores)                  # ceil
    tm_eff = min(tm, tm_cap, ((rows_per_core + 7) // 8) * 8)
    tm_eff = max(8, (tm_eff // 8) * 8)

    steps = -(-rows_per_core // tm_eff)                 # row tiles per core
    n_padded = num_cores * steps * tm_eff
    if n_padded != n:
        pred = jnp.pad(pred, ((0, n_padded - n), (0, 0)))

    out = pl.pallas_call(
        functools.partial(pnorm_kernel, p=float(p), n_rows=n, tm=tm_eff),
        out_shape=jax.ShapeDtypeStruct((num_cores, 8, 128), jnp.float32),
        grid_spec=pltpu.PrefetchScalarGridSpec(
            num_scalar_prefetch=0,
            grid=(num_cores, steps),
            in_specs=[pl.BlockSpec((tm_eff, c), lambda j, i: (j * steps + i, 0))],
            out_specs=pl.BlockSpec((1, 8, 128), lambda j, i: (j, 0, 0)),
            scratch_shapes=[pltpu.VMEM((8, c), jnp.float32)],
        ),
        compiler_params=pltpu.CompilerParams(
            dimension_semantics=("parallel", "arbitrary"),  # cores x reduction
            vmem_limit_bytes=32 * 1024 * 1024,
        ),
    )(pred)
    # Each core wrote (its partial row-sum)/N broadcast over its output tile;
    # summing the per-core partials gives the mean over all rows.
    return jnp.sum(out[:, 0, 0])


def pnorm_ref(pred, p=0.5):
    sm = jax.nn.softmax(pred.astype(jnp.float32), axis=1)
    sm = jnp.clip(sm, EPS, 1.0)
    return jnp.mean(jnp.sum(sm ** p, axis=1))


if __name__ == "__main__":
    key = jax.random.PRNGKey(0)
    N, C = 16, 32                      # batch of 16 rows, 32 classes
    pred = jax.random.normal(key, (N, C), dtype=jnp.float32) * 3.0

    # p = 0.5 (sqrt fast path)
    out = jax.block_until_ready(pnorm(pred, p=0.5))
    ref = pnorm_ref(pred, p=0.5)
    assert jnp.allclose(out, ref, rtol=1e-5, atol=1e-5), (out, ref)

    # general-p path (log-domain power with folded eps clamp)
    out2 = jax.block_until_ready(pnorm(pred, p=0.7))
    ref2 = pnorm_ref(pred, p=0.7)
    assert jnp.allclose(out2, ref2, rtol=1e-5, atol=1e-5), (out2, ref2)

    print("KERNEL_OK")
</pallas_src>

<mosaic_0001>
module attributes {stable_mosaic.version = 11 : i64} {
  func.func @pnorm_kernel(%arg0: i32, %arg1: i32, %arg2: memref<8x32xf32, #tpu.memory_space<vmem>>, %arg3: memref<1x8x128xf32, #tpu.memory_space<vmem>>, %arg4: memref<8x32xf32, #tpu.memory_space<vmem>>) attributes {dimension_semantics = [#tpu.dimension_semantics<parallel>, #tpu.dimension_semantics<arbitrary>], iteration_bounds = array<i64: 2, 1>, scalar_prefetch = 0 : i64, scratch_operands = 1 : i64, tpu.core_type = #tpu.core_type<tc>, window_params = [{transform_indices = @transform_0, window_bounds = array<i64: 8, 32>}, {transform_indices = @transform_1, window_bounds = array<i64: 1, 8, 128>}]} {
    %c0_i32 = arith.constant 0 : i32
    %0 = arith.cmpi eq, %arg1, %c0_i32 : i32
    %1 = arith.extui %0 : i1 to i32
    %c0_i32_0 = arith.constant 0 : i32
    %2 = arith.cmpi ne, %1, %c0_i32_0 : i32
    scf.if %2 {
      %cst_13 = arith.constant 0.000000e+00 : f32
      %36 = vector.broadcast %cst_13 : f32 to vector<8x32xf32>
      %c0_14 = arith.constant 0 : index
      %c0_15 = arith.constant 0 : index
      %37 = vector.load %arg4[%c0_14, %c0_15] : memref<8x32xf32, #tpu.memory_space<vmem>>, vector<8x32xf32>
      tpu.vector_store %arg4[%c0_14, %c0_15], %36 {strides = array<i32>} : memref<8x32xf32, #tpu.memory_space<vmem>>, vector<8x32xf32>,
    } else {
    }
    %c0 = arith.constant 0 : index
    %c0_1 = arith.constant 0 : index
    %3 = vector.load %arg2[%c0, %c0_1] : memref<8x32xf32, #tpu.memory_space<vmem>>, vector<8x32xf32>
    %cst = arith.constant dense<0xFF800000> : vector<8xf32>
    %4 = vector.multi_reduction <maximumf>, %3, %cst [1] : vector<8x32xf32> to vector<8xf32>
    %5 = vector.shape_cast %4 : vector<8xf32> to vector<8x1xf32>
    %6 = vector.broadcast %5 : vector<8x1xf32> to vector<8x32xf32>
    %7 = arith.subf %3, %6 : vector<8x32xf32>
    %8 = math.exp %7 : vector<8x32xf32>
    %cst_2 = arith.constant dense<0.000000e+00> : vector<8xf32>
    %9 = vector.multi_reduction <add>, %8, %cst_2 [1] : vector<8x32xf32> to vector<8xf32>
    %10 = vector.shape_cast %9 : vector<8xf32> to vector<8x1xf32>
    %cst_3 = arith.constant 1.000000e+00 : f32
    %11 = vector.broadcast %cst_3 : f32 to vector<8x1xf32>
    %12 = arith.divf %11, %10 : vector<8x1xf32>
    %13 = vector.broadcast %12 : vector<8x1xf32> to vector<8x32xf32>
    %14 = arith.mulf %8, %13 : vector<8x32xf32>
    %cst_4 = arith.constant 9.99999997E-7 : f32
    %15 = vector.broadcast %cst_4 : f32 to vector<8x32xf32>
    %16 = arith.maximumf %14, %15 : vector<8x32xf32>
    %17 = math.sqrt %16 : vector<8x32xf32>
    %c1_i32 = arith.constant 1 : i32
    %18 = arith.muli %arg0, %c1_i32 : i32
    %19 = arith.addi %18, %arg1 : i32
    %c8_i32 = arith.constant 8 : i32
    %20 = arith.muli %19, %c8_i32 : i32
    %21 = tpu.iota {dimensions = array<i32: 0>} : vector<8x32xi32>
    %22 = vector.broadcast %20 : i32 to vector<8x32xi32>
    %23 = arith.addi %22, %21 : vector<8x32xi32>
    %c16_i32 = arith.constant 16 : i32
    %24 = vector.broadcast %c16_i32 : i32 to vector<8x32xi32>
    %25 = arith.cmpi slt, %23, %24 : vector<8x32xi32>
    %cst_5 = arith.constant 0.000000e+00 : f32
    %26 = vector.broadcast %cst_5 : f32 to vector<8x32xf32>
    %27 = arith.select %25, %17, %26 : vector<8x32xi1>, vector<8x32xf32>
    %c0_6 = arith.constant 0 : index
    %c0_7 = arith.constant 0 : index
    %28 = vector.load %arg4[%c0_6, %c0_7] : memref<8x32xf32, #tpu.memory_space<vmem>>, vector<8x32xf32>
    %29 = vector.shape_cast %27 : vector<8x32xf32> to vector<1x8x32xf32>
    %cst_8 = arith.constant dense<0.000000e+00> : vector<8x32xf32>
    %30 = vector.multi_reduction <add>, %29, %cst_8 [0] : vector<1x8x32xf32> to vector<8x32xf32>
    %31 = arith.addf %28, %30 : vector<8x32xf32>
    %c0_9 = arith.constant 0 : index
    %c0_10 = arith.constant 0 : index
    %32 = vector.load %arg4[%c0_9, %c0_10] : memref<8x32xf32, #tpu.memory_space<vmem>>, vector<8x32xf32>
    tpu.vector_store %arg4[%c0_9, %c0_10], %31 {strides = array<i32>} : memref<8x32xf32, #tpu.memory_space<vmem>>, vector<8x32xf32>,
    %c0_i32_11 = arith.constant 0 : i32
    %33 = arith.cmpi eq, %arg1, %c0_i32_11 : i32
    %34 = arith.extui %33 : i1 to i32
    %c0_i32_12 = arith.constant 0 : i32
    %35 = arith.cmpi ne, %34, %c0_i32_12 : i32
    scf.if %35 {
      %c0_13 = arith.constant 0 : index
      %c0_14 = arith.constant 0 : index
      %36 = vector.load %arg4[%c0_13, %c0_14] : memref<8x32xf32, #tpu.memory_space<vmem>>, vector<8x32xf32>
      %37 = vector.shape_cast %36 : vector<8x32xf32> to vector<1x8x32xf32>
      %cst_15 = arith.constant dense<0.000000e+00> : vector<1xf32>
      %38 = vector.multi_reduction <add>, %37, %cst_15 [1, 2] : vector<1x8x32xf32> to vector<1xf32>
      %39 = vector.shape_cast %38 : vector<1xf32> to vector<1x1x1xf32>
      %40 = vector.extract %39[0, 0, 0] : f32 from vector<1x1x1xf32>
      %cst_16 = arith.constant 6.250000e-02 : f32
      %41 = arith.mulf %40, %cst_16 : f32
      %cst_17 = arith.constant 0.000000e+00 : f32
      %42 = vector.broadcast %cst_17 : f32 to vector<1x8x128xf32>
      %43 = vector.broadcast %41 : f32 to vector<1x8x128xf32>
      %44 = arith.addf %42, %43 : vector<1x8x128xf32>
      %c0_18 = arith.constant 0 : index
      %c0_19 = arith.constant 0 : index
      %c0_20 = arith.constant 0 : index
      %45 = vector.load %arg3[%c0_18, %c0_19, %c0_20] : memref<1x8x128xf32, #tpu.memory_space<vmem>>, vector<1x8x128xf32>
      tpu.vector_store %arg3[%c0_18, %c0_19, %c0_20], %44 {strides = array<i32>} : memref<1x8x128xf32, #tpu.memory_space<vmem>>, vector<1x8x128xf32>,
    } else {
    }
    return
  }
  func.func @transform_0(%arg0: i32, %arg1: i32) -> (i32, i32) {
    %c1_i32 = arith.constant 1 : i32
    %0 = arith.muli %arg0, %c1_i32 : i32
    %1 = arith.addi %0, %arg1 : i32
    %c0_i32 = arith.constant 0 : i32
    %c0_i32_0 = arith.constant 0 : i32
    return %1, %c0_i32 : i32, i32
  }
  func.func @transform_1(%arg0: i32, %arg1: i32) -> (i32, i32, i32) {
    %c0_i32 = arith.constant 0 : i32
    %c0_i32_0 = arith.constant 0 : i32
    %c0_i32_1 = arith.constant 0 : i32
    return %arg0, %c0_i32, %c0_i32_0 : i32, i32, i32
  }
}

</mosaic_0001>

<bundles_post_ra>
// kernel: tpu_custom_call.1
= control target key start
LH: loop header
LB: loop body
LE: loop exit
PB: predicated region body
PF: predicated region fallthrough
CT: control target
= control target key end

     0   :  { %6 = vsyncpa [#allocation4], 0  ;;  %s693_s0 = inlined_call_operand.hbm [shape: f32[16,32], index: 0, kind: input, shape index: {}]   ;;  %s694_s1 = inlined_call_operand.hbm [shape: f32[2,8,128], index: 1, kind: output, shape index: {}]  }
   0x1   :  { %8 = vsyncpa [#allocation4 + $0x1], 0 }
   0x2   :  { %9 = vsyncpa [#allocation5], 0 }
   0x3   :  { %11 = vsyncpa [#allocation5 + $0x1], 0  ;;  %s511_s6 = smov 0   ;;  %s513_s7 = smov 0  }
   0x4   :  { %s515_s8 = smov 0   ;;  %s517_s9 = smov 0  }
   0x5   :  { %s519_s10 = smov 0   ;;  %s521_s11 = smov 0  }
   0x6 LB: > { %s299_s12 = sadd.s32 4294967295, %s496_s11   ;;  %s300_s13 = sadd.s32 4294967294, %s496_s11   ;;  %s496_s11 = sphi %s521_s11, %s17_s11   ;;  %s492_s10 = sphi %s519_s10, %s710_s10   ;;  %s488_s9 = sphi %s517_s9, %s709_s9   ;;  %s484_s8 = sphi %s515_s8, %s708_s8   ;;  %s480_s7 = sphi %s513_s7, %s707_s7   ;;  %s476_s6 = sphi %s511_s6, %s706_s6  }
   0x7   : > { %s29_s14 = sadd.s32 1, %s492_s10  ;;  %s38_s15 = sadd.s32 1, %s484_s8 }
   0x8   : > { %p31_p0 = scmp.ge.s32.totalorder %s29_s14, 2  ;;  %p45_p1 = scmp.ne.s32.totalorder %s484_s8, %s480_s7 }
   0x9   : > { %p46_p2 = scmp.eq.s32.totalorder %s496_s11, 0  ;;  %p51_p3 = scmp.ne.s32.totalorder %s480_s7, %s476_s6 }
   0xa   : > { %s712_s14 = smov (%p31_p0, %s29_s14), 0  ;;  %p52_p5 = scmp.eq.s32.totalorder %s299_s12, 0 }
   0xb   : > { %p552_p4 = por %p46_p2, %p45_p1  ;;  %s35_s17 = ssub.s32 %s492_s10, %s712_s14 }
   0xc   : > { %p75_p6 = scmp.eq.s32.totalorder %s299_s12, 1  ;;  %p36_p7 = scmp.eq.s32.totalorder %s35_s17, 0 }
   0xd   : > { %p558_p8 = por %p52_p5, %p51_p3  ;;  %p81_p10 = scmp.eq.s32.totalorder %s300_s13, 1 }
   0xe   : > { %p562_p9 = por %p75_p6, %p45_p1  ;;  %p327_p13 = scmp.lt.s32.totalorder %s496_s11, 2 }
   0xf   : > { %s567_s20 = scalar_select %p36_p7, %s484_s8, %s38_s15  }
  0x10   : > { %s698_s19 = scalar_select %p562_p9, 1, 0 }
  0x11   : > { %p569_p11 = por %p81_p10, %p51_p3  ;;  %s101_s22 = sand.u32 1, %s484_s8  }
  0x12   : > { %s303_s23 = sshll.u32 %s101_s22, 3  ;;  %s304_s24 = sshll.u32 %s492_s10, 7 }
  0x13   : > { %s699_s21 = scalar_select %p569_p11, 1, 0 }
  0x14   : > { %s580_s27 = scalar_lea.hbm %s693_s0, %s304_s24  ;;  %s105_s28 = scalar_lea.vmem [#allocation3], %s303_s23 }
  0x15   : > { %s113_s29 = sshll.u32 %s105_s28, 4  ;;  %p586_p0 = pnand %p327_p13, %p552_p4  ;;  %s582_s29 = int_to_ptr.vmem [resolvable:$true] %s113_s29 }
  0x16   : > { %s102_s2 = scalar_lea.sflag [#allocation4], %s101_s22  ;;  %s384_s3 = scalar_lea.hbm %s580_s27, 128 }
  0x17   : > { %p385_p3 = scmp.ne.s32.totalorder %s580_s27, %s384_s3  ;;  %p386_p5 = pneg %p586_p0 }
  0x18   : > { %s389_s12 = scalar_lea.hbm %s693_s0, 256  ;;  %p390_p4 = scmp.lt.u32.totalorder %s580_s27, %s693_s0 }
  0x19   : > { %p387_p6 = pnand %p386_p5, %p385_p3  ;;  %p391_p10 = scmp.lt.u32.totalorder %s389_s12, %s384_s3 }
  0x1a   : > { %p393_p12 = scmp.lt.u32.totalorder %s384_s3, %s580_s27 }
  0x1b   : > { %p388_p7 = pneg %p387_p6  ;;  %p392_p13 = por %p391_p10, %p390_p4 }
  0x1d   : > { %p394_p1 = por %p393_p12, %p392_p13 }
  0x1f   : > { %p395_p2 = pnand %p394_p1, %p388_p7 }
  0x21   : > { %398 = shalt.err (!%p395_p2)
}
  0x22   : > { %s399_s16 = scalar_lea.vmem %s582_s29, 128  ;;  %s498_s17 = smov [#allocation3]  }
  0x23   : > { %p400_p3 = scmp.ne.s32.totalorder %s582_s29, %s399_s16  ;;  %s404_s22 = sshll.u32 %s498_s17, 4  ;;  %s405_s22 = int_to_ptr.vmem [resolvable:$false] %s404_s22 }
  0x24   : > { %s406_s23 = scalar_lea.vmem %s405_s22, 256  ;;  %p407_p9 = scmp.lt.s32.totalorder %s582_s29, %s405_s22 }
  0x25   : > { %p402_p6 = pnand %p400_p3, %p386_p5  ;;  %p408_p4 = scmp.lt.s32.totalorder %s406_s23, %s399_s16 }
  0x27   : > { %p403_p11 = pneg %p402_p6  ;;  %p409_p10 = por %p408_p4, %p407_p9 }
  0x29   : > { %p410_p12 = pnand %p409_p10, %p403_p11 }
  0x2b   : > { %413 = shalt.err (!%p410_p12)
}
  0x2c   : > { %322 = dma.hbm_to_vmem [thread:$0]  (!%p586_p0), %s580_s27, 128, %s582_s29, %s102_s2  }
  0x2d   : > { %p701_p1 = scmp.lt.s32.totalorder %s496_s11, 3  ;;  %p702_p2 = scmp.ge.s32.totalorder %s496_s11, 1 }
  0x2f   : > { %p119_p5 = pnand %p702_p2, %p701_p1 }
  0x30   : > { %s622_s24 = sand.u32 (!%p119_p5), 1, %s480_s7  }
  0x31   : > { %122 = sbr.rel (%p119_p5) target bundleno = 622 (0x26e), region = 24  ;;  %s306_s25 = sshll.u32 (!%p119_p5), %s622_s24, 3 }
  0x32   : > { %s125_s26 = scalar_lea.sflag (!%p119_p5), [#allocation4], %s622_s24  ;;  %s128_s28 = scalar_lea.vmem (!%p119_p5), [#allocation3], %s306_s25 }
  0x38   : > { %467 = dma.done.wait (%p558_p8), %s125_s26, 128  }
  0x39   : > { %469 = vsyncadd (%p558_p8), %s125_s26, 4294967168  ;;  %vm152_vm0 = vcmask 261120   ;;  %v499_v0 = vmov 0.0   ;;  %v154_v1 = vld [vmem:[%s128_s28] sm:$0xff]  ;;  %v178_v12 = vlaneseq  ;;  %s308_s18 = sshll.u32 %s488_s9, 3  ;;  %s146_s27 = scalar_lea.vmem [#allocation6], %s306_s25 }
  0x3a   : > { %153 = vst.msk [vmem:[#allocation2] sm:$0xff] %vm152_vm0, %v499_v0  ;;  %v156_v2 = vsel %vm152_vm0, %v154_v1, -inf  ;;  %v180_v14 = vstv %s308_s18  ;;  %s220_s29 = sshll.u32 %s146_s27, 4  ;;  %s310_s30 = sshll.u32 %s488_s9, 7  ;;  %s646_s29 = int_to_ptr.vmem [resolvable:$true] %s220_s29 }
  0x3b   : > { %157 = vmax.xlane.f32.xlu0 %v156_v2  ;;  %v179_v13 = vshrl.u32 %v178_v12, 7  ;;  %s644_s12 = scalar_lea.hbm %s694_s1, %s310_s30  ;;  %s207_s13 = scalar_lea.sflag [#allocation5], %s622_s24 }
  0x3c   : > { %s414_s15 = scalar_lea.vmem %s646_s29, 128  ;;  %p703_p9 = scmp.ne.s32.totalorder %s698_s19, 0 }
  0x3d   : > { %v181_v15 = vadd.s32 %v180_v14, %v179_v13  ;;  %p415_p8 = scmp.ne.s32.totalorder %s646_s29, %s414_s15  ;;  %s500_s9 = smov [#allocation6]  }
  0x3e   : > { %s418_s16 = sshll.u32 %s500_s9, 4  ;;  %s419_s16 = int_to_ptr.vmem [resolvable:$false] %s418_s16 }
  0x3f   : > { %vm182_vm1 = vcmp.lt.s32.totalorder %v181_v15, 16  ;;  %p416_p11 = pnand %p415_p8, %p703_p9  ;;  %s420_s17 = scalar_lea.vmem %s419_s16, 256 }
  0x40   : > { %p421_p7 = scmp.lt.s32.totalorder %s646_s29, %s419_s16  ;;  %p422_p13 = scmp.lt.s32.totalorder %s420_s17, %s414_s15 }
  0x41   : > { %v184_v20 = vld [vmem:[#allocation2] sm:$0xff]  ;;  %p417_p0 = pneg %p416_p11 }
  0x42   : > { %p423_p3 = por %p422_p13, %p421_p7 }
  0x44   : > { %p424_p6 = pnand %p423_p3, %p417_p0 }
  0xc8   : > { %v158_v3 = vpop.xlane.xlu0 %157 }
  0xc9   : > { %v159_v4 = vsub.f32 %v154_v1, %v158_v3 }
  0xcb   : > { %v160_v5 = vmul.f32 1.442695, %v159_v4 }
  0xcd   : > { %378 = vpow2.f32 %v160_v5 }
  0xd7   : > { %v379_v6 = vpop.eup %378 }
  0xd8   : > { %v162_v7 = vsel %vm152_vm0, %v379_v6, 0.0 }
  0xd9   : > { %163 = vadd.xlane.f32.xlu0 %v162_v7 }
 0x166   : > { %v164_v8 = vpop.xlane.xlu0 %163 }
 0x167   : > { %380 = vrcp.f32 %v164_v8 }
 0x171   : > { %v381_v9 = vpop.eup %380 }
 0x172   : > { %v167_v10 = vmul.f32 %v381_v9, %v379_v6 }
 0x174   : > { %v168_v11 = vmax.f32 %v167_v10, 1e-06 }
 0x176   : > { %382 = vrsqrt.f32 %v168_v11  ;;  %vm171_vm2 = vcmp.eq.f32.partialorder %v168_v11, inf  ;;  %v174_v18 = vand.u32 2147483648, %v168_v11  ;;  %vm173_vm3 = vcmp.eq.f32.partialorder %v168_v11, 0.0 }
 0x180   : > { %v383_v16 = vpop.eup %382 }
 0x181   : > { %v170_v17 = vmul.f32 %v383_v16, %v168_v11 }
 0x183   : > { %v172_v19 = vsel %vm171_vm2, %v168_v11, %v170_v17 }
 0x184   : > { %v175_v21 = vsel %vm173_vm3, %v174_v18, %v172_v19 }
 0x185   : > { %v183_v22 = vsel %vm182_vm1, %v175_v21, 0.0 }
 0x186   : > { %v186_v23 = vadd.f32 %v184_v20, %v183_v22 }
 0x188   : > { %187 = vst.msk [vmem:[#allocation2] sm:$0xff] %vm152_vm0, %v186_v23 }
 0x18f   : > { %v191_v24 = vld [vmem:[#allocation2] sm:$0xff] }
 0x190   : > { %v192_v25 = vsel %vm152_vm0, %v191_v24, 0.0 }
 0x191   : > { %193 = vadd.xlane.f32.xlu1 %v192_v25 }
 0x21e   : > { %v194_v26 = vpop.xlane.xlu1 %193 }
 0x21f   : > { %v195_v27 = vrot.slane %v194_v26, 4 }
 0x221   : > { %v196_v28 = vadd.f32 %v195_v27, %v194_v26 }
 0x223   : > { %v197_v29 = vrot.slane %v196_v28, 2 }
 0x225   : > { %v198_v30 = vadd.f32 %v197_v29, %v196_v28 }
 0x227   : > { %v199_v31 = vrot.slane %v198_v30, 1 }
 0x229   : > { %v200_v32 = vadd.f32 %v199_v31, %v198_v30 }
 0x22b   : > { %313 = vpush %v200_v32 }
 0x25c   : > { %s314_s2 = spop %313 }
 0x25d   : > { %s202_s3 = smul.f32 0.0625, %s314_s2 }
 0x25f   : > { %v203_v33 = vstv %s202_s3 }
 0x260   : > { %205 = vst [vmem:[%s146_s27] sm:$0xff] %v203_v33 }
 0x261   : > { %427 = shalt.err (!%p424_p6)
}
 0x262   : > { %s428_s22 = scalar_lea.hbm %s644_s12, 128  ;;  %s432_s25 = scalar_lea.hbm %s694_s1, 256 }
 0x263   : > { %p429_p4 = scmp.ne.s32.totalorder %s644_s12, %s428_s22  ;;  %p433_p1 = scmp.lt.u32.totalorder %s644_s12, %s694_s1 }
 0x264   : > { %p434_p2 = scmp.lt.u32.totalorder %s432_s25, %s428_s22  ;;  %p436_p8 = scmp.lt.u32.totalorder %s428_s22, %s644_s12 }
 0x265   : > { %p430_p10 = pnand %p429_p4, %p703_p9 }
 0x266   : > { %p435_p5 = por %p434_p2, %p433_p1 }
 0x267   : > { %p431_p12 = pneg %p430_p10 }
 0x268   : > { %p437_p11 = por %p436_p8, %p435_p5 }
 0x26a   : > { %p438_p0 = pnand %p437_p11, %p431_p12 }
 0x26c   : > { %441 = shalt.err (!%p438_p0)
}
 0x26d   : > { %317 = dma.vmem_to_hbm [thread:$0]  (%p703_p9), %s646_s29, 128, %s644_s12, %s207_s13  }
 0x26e PF: > { %s232_s18 = sand.u32 1, %s476_s6   ;;  %p704_p7 = scmp.ne.s32.totalorder %s699_s21, 0 }
 0x26f   : > { %p705_p13 = scmp.ge.s32.totalorder %s496_s11, 2  ;;  %s233_s27 = scalar_lea.sflag [#allocation5], %s232_s18 }
 0x271   : > { %p324_p3 = pnand %p705_p13, %p704_p7 }
 0x273   : > { %471 = dma.done.wait (!%p324_p3), %s233_s27, 128  }
 0x274   : > { %473 = vsyncadd (!%p324_p3), %s233_s27, 4294967168  ;;  %s17_s11 = sadd.s32 1, %s496_s11   ;;  %s706_s6 = smov %s480_s7 }
 0x275   : > { %p14_p6 = scmp.ge.s32.totalorder %s17_s11, 4   ;;  %s707_s7 = smov %s484_s8 }
 0x276   : > { %s708_s8 = smov %s567_s20  ;;  %s709_s9 = smov %s492_s10 }
 0x277   : > { %s710_s10 = smov %s712_s14  ;;  %16 = sbr.rel (!%p14_p6) target bundleno = 6 (0x6), region = 77 }
 0x27e   :  { %238 = vsyncpa [#allocation4], 1 }
 0x27f   :  { %240 = vsyncpa [#allocation4 + $0x1], 1 }
 0x280   :  { %241 = vsyncpa [#allocation5], 1 }
 0x281   :  { %243 = vsyncpa [#allocation5 + $0x1], 1 }

</bundles_post_ra>
